<compile_context>
chip_gen: v7x
topology: tpu7x:2x2x1
jax: 0.10.0
libtpu: 0.0.40
codegen_flags: <defaults>
</compile_context>

<pallas_src>
import functools
import math

import jax
import jax.numpy as jnp
import numpy as np
from jax.experimental import pallas as pl
from jax.experimental.pallas import tpu as pltpu

LN_EPS = 1e-5  # nn.LayerNorm default

# Row layout of the packed coefficient array handed to the kernel:
#   rows 0..14 : per-head quadratic-form coefficients (sigma folded in),
#                each repeated w_pad times along lanes (head-major layout);
#   row 15     : A        (LN quadratic coefficient of t^2)
#   row 16     : 2*B      (LN quadratic coefficient of t)
#   row 17     : C + eps  (LN quadratic constant, eps folded in)
_NUM_COEF_ROWS = 18
_COEF_ROWS_PAD = 24  # sublane-aligned


def _round_up(a, m):
    return ((a + m - 1) // m) * m


def _cdiv(a, b):
    return (a + b - 1) // b


def _rbf_embedding_kernel(tok_ref, coef_ref, out_ref, *, last_idx):
    """exp(sigma_h * ||q_h - k_h||^2) for a block of segments, fully folded.

    tok_ref : (tb, n_head*w_pad) f32 — token value, tiled per head block
    coef_ref: (_COEF_ROWS_PAD, n_head*w_pad) f32 — precomputed coefficients
    out_ref : (tb, n_head*w_pad) f32 — head-major RBF attention values
    """
    t = tok_ref[...]
    cf = coef_ref[...]

    # Closed-form LayerNorm scale: r(t) = rsqrt(t^2*A + 2t*B + C + eps).
    r = jax.lax.rsqrt(t * t * cf[15:16] + t * cf[16:17] + cf[17:18])

    c = r * t                                  # K-path scalars, every token
    d = r
    a = c[:, last_idx:last_idx + 1]            # Q-path scalars: last real token
    b = d[:, last_idx:last_idx + 1]            # of each segment (lane gather)

    # sigma_h * ||q - k||^2 as a quadratic form in (a, b, c, d).
    dist = ((a * a) * cf[0:1] + (a * b) * cf[1:2] + (b * b) * cf[2:3]
            + a * cf[3:4] + b * cf[4:5] + cf[5:6]
            + (c * c) * cf[6:7] + (c * d) * cf[7:8] + (d * d) * cf[8:9]
            + c * cf[9:10] + d * cf[10:11]
            + (a * c) * cf[11:12] + (a * d) * cf[12:13]
            + (b * c) * cf[13:14] + (b * d) * cf[14:15])

    out_ref[...] = jnp.exp(dist)


def _fold_coefficients(params, *, n_head, w_pad):
    """Fold W_A + LayerNorm + W_Q/W_K + sigma into quadratic-form coefficients.

    All f32.  Returns a (_COEF_ROWS_PAD, n_head*w_pad) array whose per-head
    coefficient rows line up with the head-major token layout.
    """
    n_embd = params["wa"].shape[1]
    head_dim = n_embd // n_head

    wa = params["wa"][0]                       # (E,)  — c_in == 1
    ba = params["ba"]
    gamma, beta = params["gamma"], params["beta"]

    wa_c = wa - jnp.mean(wa)
    ba_c = ba - jnp.mean(ba)
    A = jnp.mean(wa_c * wa_c)
    B = jnp.mean(wa_c * ba_c)
    C = jnp.mean(ba_c * ba_c)

    def fold(w, bias):
        u = (wa_c * gamma) @ w                 # coefficient of r*t
        v = (ba_c * gamma) @ w                 # coefficient of r
        w0 = beta @ w + bias                   # constant term
        return u, v, w0

    u_q, v_q, w_q = fold(params["wq"], params["bq"])
    u_k, v_k, w_k = fold(params["wk"], params["bk"])
    w_d = w_q - w_k

    def hip(x, y):                             # per-head inner product -> (n_head,)
        return jnp.sum(x.reshape(n_head, head_dim) * y.reshape(n_head, head_dim),
                       axis=-1)

    sig = params["sigma"]
    coef_h = jnp.stack([
        sig * hip(u_q, u_q),                   # * a^2
        2.0 * sig * hip(u_q, v_q),             # * a*b
        sig * hip(v_q, v_q),                   # * b^2
        2.0 * sig * hip(u_q, w_d),             # * a
        2.0 * sig * hip(v_q, w_d),             # * b
        sig * hip(w_d, w_d),                   # * 1
        sig * hip(u_k, u_k),                   # * c^2
        2.0 * sig * hip(u_k, v_k),             # * c*d
        sig * hip(v_k, v_k),                   # * d^2
        -2.0 * sig * hip(u_k, w_d),            # * c
        -2.0 * sig * hip(v_k, w_d),            # * d
        -2.0 * sig * hip(u_q, u_k),            # * a*c
        -2.0 * sig * hip(u_q, v_k),            # * a*d
        -2.0 * sig * hip(v_q, u_k),            # * b*c
        -2.0 * sig * hip(v_q, v_k),            # * b*d
    ], axis=0).astype(jnp.float32)             # (15, n_head)

    hw = n_head * w_pad
    coef_rows = jnp.repeat(coef_h, w_pad, axis=1)                  # (15, hw)
    ln_rows = (jnp.stack([A, 2.0 * B, C + LN_EPS])[:, None]
               * jnp.ones((1, hw), jnp.float32))                   # (3, hw)
    coefs = jnp.concatenate([coef_rows, ln_rows], axis=0)          # (18, hw)
    return jnp.pad(coefs, ((0, _COEF_ROWS_PAD - _NUM_COEF_ROWS), (0, 0)))


def _build_segments(x, params, *, context_window, window, stride, conv_stride):
    """Glue: down_conv + per-segment [down_sample ; window] token sequences."""
    B, L, c_in = x.shape
    assert c_in == 1, "AttentionEmbedding down_conv/cat path requires c_in == 1"
    n_segment = int((context_window - window) / stride + 1) + 1
    need = (n_segment - 1) * stride + window
    assert L >= need, f"input too short for trailing segment (need L >= {need})"

    # down_conv = Conv1d(1, 1, conv_stride, stride=conv_stride) applied NCW.
    Lo = (L - conv_stride) // conv_stride + 1
    starts = jnp.arange(Lo) * conv_stride
    patches = x[:, starts[:, None] + jnp.arange(conv_stride), 0]   # (B, Lo, k)
    down = patches @ params["conv_w"] + params["conv_b"]           # (B, Lo)
    down = down[..., None]                                         # (B, Lo, 1)

    segs = []
    for i in range(n_segment):
        st = i * stride
        cur = x[:, st:st + window, :]                              # (B, window, 1)
        segs.append(jnp.concatenate([down, cur], axis=1)[:, None])
    segs = jnp.concatenate(segs, axis=1)                           # (B, n, W_tot, 1)
    return segs.reshape(B * n_segment, segs.shape[2], c_in), n_segment


def attention_embedding_forward(x, params, *, context_window, window, stride,
                                conv_stride, n_head):
    B = x.shape[0]
    segs, n_segment = _build_segments(
        x, params, context_window=context_window, window=window,
        stride=stride, conv_stride=conv_stride)
    BN, W_tot, _ = segs.shape

    # Pad the per-segment token count so n_head * w_pad is a multiple of 128
    # (lane-dense blocks and unmasked stores).
    lane_mult = 128 // math.gcd(n_head, 128)
    w_pad = _round_up(W_tot, lane_mult)
    hw = n_head * w_pad
    assert hw % 128 == 0

    # Segment-block size: amortize the ~0.35 us per grid step while keeping the
    # (tb, hw) live arrays near the 64-vreg file and blocks tiny vs. the scoped
    # VMEM limit (binding budget is v7x).  Keep >= 2 even grid steps so v7x's
    # two TensorCores both get work under dimension_semantics=("parallel",).
    tb = max(8, min(64, _round_up(BN, 8)))
    grid_n = max(2, _cdiv(BN, tb))
    if grid_n % 2:
        grid_n += 1
    bn_pad = grid_n * tb

    # Lane-dense token handoff, tiled once per head so the kernel needs zero
    # relayout to emit head-major output.
    segs2 = segs[..., 0]                                           # (BN, W_tot)
    tok = jnp.pad(segs2, ((0, bn_pad - BN), (0, w_pad - W_tot)))
    tok_tiled = jnp.tile(tok, (1, n_head)).astype(jnp.float32)     # (bn_pad, hw)

    coefs = _fold_coefficients(params, n_head=n_head, w_pad=w_pad)

    kernel = functools.partial(_rbf_embedding_kernel, last_idx=W_tot - 1)

    out = pl.pallas_call(
        kernel,
        grid=(grid_n,),
        in_specs=[
            pl.BlockSpec((tb, hw), lambda i: (i, 0)),              # tokens
            pl.BlockSpec((_COEF_ROWS_PAD, hw), lambda i: (0, 0)),  # coefficients
        ],
        out_specs=pl.BlockSpec((tb, hw), lambda i: (i, 0)),
        out_shape=jax.ShapeDtypeStruct((bn_pad, hw), jnp.float32),
        compiler_params=pltpu.CompilerParams(
            dimension_semantics=("parallel",)),
    )(tok_tiled, coefs)

    # Drop segment/token padding, then 'b h l -> b (h l)' and '(b n) d -> b n d'.
    out = out[:BN].reshape(BN, n_head, w_pad)[:, :, :W_tot]
    return out.reshape(BN, n_head * W_tot).reshape(B, n_segment, n_head * W_tot)


def reference_forward(x, params, *, context_window, window, stride,
                      conv_stride, n_head):
    """Pure-JAX mirror of the PyTorch forward (rbf branch), for verification."""
    B = x.shape[0]
    segs, n_segment = _build_segments(
        x, params, context_window=context_window, window=window,
        stride=stride, conv_stride=conv_stride)
    BN, W_tot, _ = segs.shape
    n_embd = params["wa"].shape[1]
    head_dim = n_embd // n_head

    emb = segs @ params["wa"] + params["ba"]
    mean = emb.mean(-1, keepdims=True)
    var = ((emb - mean) ** 2).mean(-1, keepdims=True)
    xn = (emb - mean) / jnp.sqrt(var + LN_EPS) * params["gamma"] + params["beta"]
    q = xn @ params["wq"] + params["bq"]
    k = xn @ params["wk"] + params["bk"]
    q = q.reshape(BN, W_tot, n_head, head_dim).transpose(0, 2, 1, 3)
    k = k.reshape(BN, W_tot, n_head, head_dim).transpose(0, 2, 1, 3)
    q_last = q[:, :, -1:, :]
    dist = ((q_last - k) ** 2).sum(-1)                       # (BN, h, W_tot)
    attn = jnp.exp(dist * params["sigma"][None, :, None])
    return attn.reshape(BN, n_head * W_tot).reshape(B, n_segment, -1)


def init_params(key, *, c_in, n_embd, n_head, conv_stride):
    ks = jax.random.split(key, 11)
    s = 0.1
    return {
        "conv_w": jax.random.normal(ks[0], (conv_stride,), jnp.float32) * s,
        "conv_b": jax.random.normal(ks[1], (), jnp.float32) * s,
        "wa":    jax.random.normal(ks[2], (c_in, n_embd), jnp.float32) * s,
        "ba":    jax.random.normal(ks[3], (n_embd,), jnp.float32) * s,
        "gamma": 1.0 + 0.1 * jax.random.normal(ks[4], (n_embd,), jnp.float32),
        "beta":  0.1 * jax.random.normal(ks[5], (n_embd,), jnp.float32),
        "wq":    jax.random.normal(ks[6], (n_embd, n_embd), jnp.float32) * s,
        "bq":    jax.random.normal(ks[7], (n_embd,), jnp.float32) * s,
        "wk":    jax.random.normal(ks[8], (n_embd, n_embd), jnp.float32) * s,
        "bk":    jax.random.normal(ks[9], (n_embd,), jnp.float32) * s,
        "sigma": jax.random.uniform(ks[10], (n_head,), jnp.float32) * 0.1,
    }


if __name__ == "__main__":
    context_window, window, stride, conv_stride = 16, 8, 4, 1
    c_in, n_head = 1, 4
    n_embd = n_head * 8                      # module overrides n_embd = n_head * 8
    B = 2
    # Input length = context_window + stride so every segment (including the
    # module's extra "+1" segment) gets a full `window` of tokens.
    L = context_window + stride              # 20

    key = jax.random.PRNGKey(0)
    kx, kp = jax.random.split(key)
    x = jax.random.normal(kx, (B, L, c_in), jnp.float32)
    params = init_params(kp, c_in=c_in, n_embd=n_embd, n_head=n_head,
                         conv_stride=conv_stride)

    out = attention_embedding_forward(
        x, params, context_window=context_window, window=window,
        stride=stride, conv_stride=conv_stride, n_head=n_head)
    out = jax.block_until_ready(out)

    ref = reference_forward(
        x, params, context_window=context_window, window=window,
        stride=stride, conv_stride=conv_stride, n_head=n_head)

    np.testing.assert_allclose(np.asarray(out), np.asarray(ref),
                               rtol=5e-3, atol=5e-4)
    print("KERNEL_OK")
</pallas_src>

<mosaic_0001>
module attributes {stable_mosaic.version = 11 : i64} {
  func.func @_rbf_embedding_kernel(%arg0: i32, %arg1: memref<8x128xf32, #tpu.memory_space<vmem>>, %arg2: memref<24x128xf32, #tpu.memory_space<vmem>>, %arg3: memref<8x128xf32, #tpu.memory_space<vmem>>) attributes {dimension_semantics = [#tpu.dimension_semantics<parallel>], iteration_bounds = array<i64: 2>, scalar_prefetch = 0 : i64, scratch_operands = 0 : i64, tpu.core_type = #tpu.core_type<tc>, window_params = [{transform_indices = @transform_0, window_bounds = array<i64: 8, 128>}, {pipeline_mode = #tpu.pipeline_mode<synchronous>, transform_indices = @transform_1, window_bounds = array<i64: 24, 128>}, {transform_indices = @transform_2, window_bounds = array<i64: 8, 128>}]} {
    %c0 = arith.constant 0 : index
    %c0_0 = arith.constant 0 : index
    %0 = vector.load %arg1[%c0, %c0_0] : memref<8x128xf32, #tpu.memory_space<vmem>>, vector<8x128xf32>
    %c0_1 = arith.constant 0 : index
    %c0_2 = arith.constant 0 : index
    %1 = vector.load %arg2[%c0_1, %c0_2] : memref<24x128xf32, #tpu.memory_space<vmem>>, vector<24x128xf32>
    %2 = arith.mulf %0, %0 : vector<8x128xf32>
    %3 = vector.extract_strided_slice %1 {offsets = [15, 0], sizes = [1, 128], strides = [1, 1]} : vector<24x128xf32> to vector<1x128xf32>
    %4 = vector.broadcast %3 : vector<1x128xf32> to vector<8x128xf32>
    %5 = arith.mulf %2, %4 : vector<8x128xf32>
    %6 = vector.extract_strided_slice %1 {offsets = [16, 0], sizes = [1, 128], strides = [1, 1]} : vector<24x128xf32> to vector<1x128xf32>
    %7 = vector.broadcast %6 : vector<1x128xf32> to vector<8x128xf32>
    %8 = arith.mulf %0, %7 : vector<8x128xf32>
    %9 = arith.addf %5, %8 : vector<8x128xf32>
    %10 = vector.extract_strided_slice %1 {offsets = [17, 0], sizes = [1, 128], strides = [1, 1]} : vector<24x128xf32> to vector<1x128xf32>
    %11 = vector.broadcast %10 : vector<1x128xf32> to vector<8x128xf32>
    %12 = arith.addf %9, %11 : vector<8x128xf32>
    %13 = math.rsqrt %12 : vector<8x128xf32>
    %14 = arith.mulf %13, %0 : vector<8x128xf32>
    %15 = vector.extract_strided_slice %14 {offsets = [0, 27], sizes = [8, 1], strides = [1, 1]} : vector<8x128xf32> to vector<8x1xf32>
    %16 = vector.extract_strided_slice %13 {offsets = [0, 27], sizes = [8, 1], strides = [1, 1]} : vector<8x128xf32> to vector<8x1xf32>
    %17 = arith.mulf %15, %15 : vector<8x1xf32>
    %18 = vector.extract_strided_slice %1 {offsets = [0, 0], sizes = [1, 128], strides = [1, 1]} : vector<24x128xf32> to vector<1x128xf32>
    %19 = vector.broadcast %17 : vector<8x1xf32> to vector<8x128xf32>
    %20 = vector.broadcast %18 : vector<1x128xf32> to vector<8x128xf32>
    %21 = arith.mulf %19, %20 : vector<8x128xf32>
    %22 = arith.mulf %15, %16 : vector<8x1xf32>
    %23 = vector.extract_strided_slice %1 {offsets = [1, 0], sizes = [1, 128], strides = [1, 1]} : vector<24x128xf32> to vector<1x128xf32>
    %24 = vector.broadcast %22 : vector<8x1xf32> to vector<8x128xf32>
    %25 = vector.broadcast %23 : vector<1x128xf32> to vector<8x128xf32>
    %26 = arith.mulf %24, %25 : vector<8x128xf32>
    %27 = arith.addf %21, %26 : vector<8x128xf32>
    %28 = arith.mulf %16, %16 : vector<8x1xf32>
    %29 = vector.extract_strided_slice %1 {offsets = [2, 0], sizes = [1, 128], strides = [1, 1]} : vector<24x128xf32> to vector<1x128xf32>
    %30 = vector.broadcast %28 : vector<8x1xf32> to vector<8x128xf32>
    %31 = vector.broadcast %29 : vector<1x128xf32> to vector<8x128xf32>
    %32 = arith.mulf %30, %31 : vector<8x128xf32>
    %33 = arith.addf %27, %32 : vector<8x128xf32>
    %34 = vector.extract_strided_slice %1 {offsets = [3, 0], sizes = [1, 128], strides = [1, 1]} : vector<24x128xf32> to vector<1x128xf32>
    %35 = vector.broadcast %15 : vector<8x1xf32> to vector<8x128xf32>
    %36 = vector.broadcast %34 : vector<1x128xf32> to vector<8x128xf32>
    %37 = arith.mulf %35, %36 : vector<8x128xf32>
    %38 = arith.addf %33, %37 : vector<8x128xf32>
    %39 = vector.extract_strided_slice %1 {offsets = [4, 0], sizes = [1, 128], strides = [1, 1]} : vector<24x128xf32> to vector<1x128xf32>
    %40 = vector.broadcast %16 : vector<8x1xf32> to vector<8x128xf32>
    %41 = vector.broadcast %39 : vector<1x128xf32> to vector<8x128xf32>
    %42 = arith.mulf %40, %41 : vector<8x128xf32>
    %43 = arith.addf %38, %42 : vector<8x128xf32>
    %44 = vector.extract_strided_slice %1 {offsets = [5, 0], sizes = [1, 128], strides = [1, 1]} : vector<24x128xf32> to vector<1x128xf32>
    %45 = vector.broadcast %44 : vector<1x128xf32> to vector<8x128xf32>
    %46 = arith.addf %43, %45 : vector<8x128xf32>
    %47 = arith.mulf %14, %14 : vector<8x128xf32>
    %48 = vector.extract_strided_slice %1 {offsets = [6, 0], sizes = [1, 128], strides = [1, 1]} : vector<24x128xf32> to vector<1x128xf32>
    %49 = vector.broadcast %48 : vector<1x128xf32> to vector<8x128xf32>
    %50 = arith.mulf %47, %49 : vector<8x128xf32>
    %51 = arith.addf %46, %50 : vector<8x128xf32>
    %52 = arith.mulf %14, %13 : vector<8x128xf32>
    %53 = vector.extract_strided_slice %1 {offsets = [7, 0], sizes = [1, 128], strides = [1, 1]} : vector<24x128xf32> to vector<1x128xf32>
    %54 = vector.broadcast %53 : vector<1x128xf32> to vector<8x128xf32>
    %55 = arith.mulf %52, %54 : vector<8x128xf32>
    %56 = arith.addf %51, %55 : vector<8x128xf32>
    %57 = arith.mulf %13, %13 : vector<8x128xf32>
    %58 = vector.extract_strided_slice %1 {offsets = [8, 0], sizes = [1, 128], strides = [1, 1]} : vector<24x128xf32> to vector<1x128xf32>
    %59 = vector.broadcast %58 : vector<1x128xf32> to vector<8x128xf32>
    %60 = arith.mulf %57, %59 : vector<8x128xf32>
    %61 = arith.addf %56, %60 : vector<8x128xf32>
    %62 = vector.extract_strided_slice %1 {offsets = [9, 0], sizes = [1, 128], strides = [1, 1]} : vector<24x128xf32> to vector<1x128xf32>
    %63 = vector.broadcast %62 : vector<1x128xf32> to vector<8x128xf32>
    %64 = arith.mulf %14, %63 : vector<8x128xf32>
    %65 = arith.addf %61, %64 : vector<8x128xf32>
    %66 = vector.extract_strided_slice %1 {offsets = [10, 0], sizes = [1, 128], strides = [1, 1]} : vector<24x128xf32> to vector<1x128xf32>
    %67 = vector.broadcast %66 : vector<1x128xf32> to vector<8x128xf32>
    %68 = arith.mulf %13, %67 : vector<8x128xf32>
    %69 = arith.addf %65, %68 : vector<8x128xf32>
    %70 = vector.broadcast %15 : vector<8x1xf32> to vector<8x128xf32>
    %71 = arith.mulf %70, %14 : vector<8x128xf32>
    %72 = vector.extract_strided_slice %1 {offsets = [11, 0], sizes = [1, 128], strides = [1, 1]} : vector<24x128xf32> to vector<1x128xf32>
    %73 = vector.broadcast %72 : vector<1x128xf32> to vector<8x128xf32>
    %74 = arith.mulf %71, %73 : vector<8x128xf32>
    %75 = arith.addf %69, %74 : vector<8x128xf32>
    %76 = vector.broadcast %15 : vector<8x1xf32> to vector<8x128xf32>
    %77 = arith.mulf %76, %13 : vector<8x128xf32>
    %78 = vector.extract_strided_slice %1 {offsets = [12, 0], sizes = [1, 128], strides = [1, 1]} : vector<24x128xf32> to vector<1x128xf32>
    %79 = vector.broadcast %78 : vector<1x128xf32> to vector<8x128xf32>
    %80 = arith.mulf %77, %79 : vector<8x128xf32>
    %81 = arith.addf %75, %80 : vector<8x128xf32>
    %82 = vector.broadcast %16 : vector<8x1xf32> to vector<8x128xf32>
    %83 = arith.mulf %82, %14 : vector<8x128xf32>
    %84 = vector.extract_strided_slice %1 {offsets = [13, 0], sizes = [1, 128], strides = [1, 1]} : vector<24x128xf32> to vector<1x128xf32>
    %85 = vector.broadcast %84 : vector<1x128xf32> to vector<8x128xf32>
    %86 = arith.mulf %83, %85 : vector<8x128xf32>
    %87 = arith.addf %81, %86 : vector<8x128xf32>
    %88 = vector.broadcast %16 : vector<8x1xf32> to vector<8x128xf32>
    %89 = arith.mulf %88, %13 : vector<8x128xf32>
    %90 = vector.extract_strided_slice %1 {offsets = [14, 0], sizes = [1, 128], strides = [1, 1]} : vector<24x128xf32> to vector<1x128xf32>
    %91 = vector.broadcast %90 : vector<1x128xf32> to vector<8x128xf32>
    %92 = arith.mulf %89, %91 : vector<8x128xf32>
    %93 = arith.addf %87, %92 : vector<8x128xf32>
    %94 = math.exp %93 : vector<8x128xf32>
    %c0_3 = arith.constant 0 : index
    %c0_4 = arith.constant 0 : index
    %95 = vector.load %arg3[%c0_3, %c0_4] : memref<8x128xf32, #tpu.memory_space<vmem>>, vector<8x128xf32>
    tpu.vector_store %arg3[%c0_3, %c0_4], %94 {strides = array<i32>} : memref<8x128xf32, #tpu.memory_space<vmem>>, vector<8x128xf32>,
    return
  }
  func.func @transform_0(%arg0: i32) -> (i32, i32) {
    %c0_i32 = arith.constant 0 : i32
    %c0_i32_0 = arith.constant 0 : i32
    return %arg0, %c0_i32 : i32, i32
  }
  func.func @transform_1(%arg0: i32) -> (i32, i32) {
    %c0_i32 = arith.constant 0 : i32
    %c0_i32_0 = arith.constant 0 : i32
    %c0_i32_1 = arith.constant 0 : i32
    return %c0_i32, %c0_i32_0 : i32, i32
  }
  func.func @transform_2(%arg0: i32) -> (i32, i32) {
    %c0_i32 = arith.constant 0 : i32
    %c0_i32_0 = arith.constant 0 : i32
    return %arg0, %c0_i32 : i32, i32
  }
}

</mosaic_0001>

<bundles_post_ra>
// kernel: tpu_custom_call.1
= control target key start
LH: loop header
LB: loop body
LE: loop exit
PB: predicated region body
PF: predicated region fallthrough
CT: control target
= control target key end

     0   :  { %7 = vsyncpa [#allocation3], 0  ;;  %s850_s0 = inlined_call_operand.hbm [shape: f32[16,128], index: 0, kind: input, shape index: {}]   ;;  %s851_s1 = inlined_call_operand.hbm [shape: f32[24,128], index: 1, kind: input, shape index: {}]   ;;  %s852_s2 = inlined_call_operand.hbm [shape: f32[16,128], index: 2, kind: output, shape index: {}]  }
   0x1   :  { %9 = vsyncpa [#allocation3 + $0x1], 0 }
   0x2   :  { %10 = vsyncpa [#allocation6], 0 }
   0x3   :  { %11 = vsyncpa [#allocation4], 0 }
   0x4   :  { %13 = vsyncpa [#allocation4 + $0x1], 0  ;;  %s645_s9 = smov 0   ;;  %s647_s10 = smov 0  }
   0x5   :  { %s649_s11 = smov 0   ;;  %s651_s12 = smov 0  }
   0x6 LB: > { %s666_s13 = sadd.s32 4294967295, %s622_s12   ;;  %s414_s14 = sadd.s32 4294967294, %s622_s12   ;;  %s622_s12 = sphi %s651_s12, %s872_s12   ;;  %s618_s11 = sphi %s649_s11, %s871_s11   ;;  %s614_s10 = sphi %s647_s10, %s870_s10   ;;  %s610_s9 = sphi %s645_s9, %s869_s9  }
   0x7   : > { %p39_p0 = scmp.ne.s32.totalorder %s614_s10, %s610_s9  ;;  %p853_p1 = scmp.eq.s32.totalorder %s666_s13, 0 }
   0x8   : > { %p90_p3 = scmp.eq.s32.totalorder %s414_s14, 1  ;;  %p415_p5 = scmp.ge.s32.totalorder %s622_s12, 1 }
   0x9   : > { %p675_p4 = por %p853_p1, %p39_p0  ;;  %p97_p7 = scmp.lt.s32.totalorder %s622_s12, 3 }
   0xa   : > { %p680_p6 = por %p90_p3, %p39_p0  ;;  %s624_s18 = smov [#allocation5]  }
   0xb   : > { %s856_s15 = scalar_select %p675_p4, 1, 0 }
   0xc   : > { %s857_s16 = scalar_select %p680_p6, 1, 0 }
   0xd   : > { %p685_p8 = pnand %p415_p5, %p97_p7  ;;  %s109_s19 = sshll.u32 %s624_s18, 4  ;;  %s689_s19 = int_to_ptr.vmem [resolvable:$true] %s109_s19 }
   0xe   : > { %s701_s21 = sadd.s32 1, %s622_s12   ;;  %s26_s22 = sadd.s32 1, %s618_s11 }
   0xf   : > { %s858_s17 = scalar_select %p685_p8, 1, 0 }
  0x10   : > { %p436_p9 = pneg %p685_p8  ;;  %s23_s23 = ssub.s32 %s622_s12, %s701_s21 }
  0x11   : > { %s494_s26 = scalar_lea.hbm %s851_s1, 384 }
  0x12   : > { %p696_p11 = pnand %p436_p9, %p853_p1  ;;  %p495_p12 = scmp.ne.s32.totalorder %s851_s1, %s494_s26 }
  0x13   : > { %p501_p5 = scmp.lt.u32.totalorder %s494_s26, %s851_s1 }
  0x14   : > { %p496_p13 = pneg %p696_p11 }
  0x16   : > { %p497_p0 = pnand %p496_p13, %p495_p12 }
  0x18   : > { %p498_p3 = pneg %p497_p0 }
  0x1a   : > { %p503_p7 = pnand %p501_p5, %p498_p3 }
  0x1c   : > { %506 = shalt.err (!%p503_p7)
}
  0x1d   : > { %s507_s3 = scalar_lea.vmem %s689_s19, 384  ;;  %p515_p2 = scmp.lt.s32.totalorder %s689_s19, %s689_s19 }
  0x1e   : > { %p508_p9 = scmp.ne.s32.totalorder %s689_s19, %s507_s3  ;;  %p516_p6 = scmp.lt.s32.totalorder %s507_s3, %s507_s3 }
  0x20   : > { %p510_p10 = pnand %p508_p9, %p496_p13  ;;  %p517_p4 = por %p516_p6, %p515_p2 }
  0x22   : > { %p511_p1 = pneg %p510_p10 }
  0x24   : > { %p518_p8 = pnand %p517_p4, %p511_p1 }
  0x26   : > { %521 = shalt.err (!%p518_p8)
}
  0x27   : > { %s625_s4 = smov 128   ;;  %s626_s5 = smov 8  }
  0x28   : > { %439 = dma.hbm_to_vmem [thread:$0]  (!%p696_p11), %s851_s1, 384, %s689_s19, [#allocation6], %s625_s4, %s625_s4, %s626_s5  }
  0x29   : > { %p24_p2 = scmp.eq.s32.totalorder %s23_s23, 0  ;;  %p33_p1 = scmp.ne.s32.totalorder %s618_s11, %s614_s10 }
  0x2a   : > { %p34_p4 = scmp.eq.s32.totalorder %s622_s12, 0  ;;  %p449_p6 = scmp.lt.s32.totalorder %s622_s12, 2 }
  0x2b   : > { %s732_s8 = scalar_select %p24_p2, %s618_s11, %s26_s22  }
  0x2c   : > { %p35_p8 = por %p34_p4, %p33_p1  ;;  %p860_p10 = scmp.eq.s32.totalorder %s666_s13, 1 }
  0x2d   : > { %s123_s18 = sand.u32 1, %s618_s11   ;;  %s419_s24 = sshll.u32 %s622_s12, 7 }
  0x2e   : > { %p736_p12 = por %p860_p10, %p33_p1  ;;  %s418_s25 = sshll.u32 %s123_s18, 3 }
  0x2f   : > { %s745_s27 = scalar_lea.hbm %s850_s0, %s419_s24  ;;  %s127_s19 = scalar_lea.vmem [#allocation2], %s418_s25 }
  0x30   : > { %s134_s22 = sshll.u32 %s127_s19, 4  ;;  %p747_p11 = pnand %p449_p6, %p35_p8  ;;  %s751_s22 = int_to_ptr.vmem [resolvable:$true] %s134_s22 }
  0x31   : > { %s124_s28 = scalar_lea.sflag [#allocation3], %s123_s18  ;;  %s522_s29 = scalar_lea.hbm %s745_s27, 128 }
  0x32   : > { %p523_p13 = scmp.ne.s32.totalorder %s745_s27, %s522_s29  ;;  %p524_p0 = pneg %p747_p11 }
  0x33   : > { %s527_s4 = scalar_lea.hbm %s850_s0, 256  ;;  %p528_p7 = scmp.lt.u32.totalorder %s745_s27, %s850_s0 }
  0x34   : > { %p525_p3 = pnand %p524_p0, %p523_p13  ;;  %p529_p9 = scmp.lt.u32.totalorder %s527_s4, %s522_s29 }
  0x35   : > { %p531_p1 = scmp.lt.u32.totalorder %s522_s29, %s745_s27 }
  0x36   : > { %p526_p5 = pneg %p525_p3  ;;  %p530_p2 = por %p529_p9, %p528_p7 }
  0x38   : > { %p532_p4 = por %p531_p1, %p530_p2 }
  0x3a   : > { %p533_p6 = pnand %p532_p4, %p526_p5 }
  0x3c   : > { %536 = shalt.err (!%p533_p6)
}
  0x3d   : > { %s537_s7 = scalar_lea.vmem %s751_s22, 128  ;;  %s627_s18 = smov [#allocation2]  }
  0x3e   : > { %p538_p8 = scmp.ne.s32.totalorder %s751_s22, %s537_s7  ;;  %s542_s24 = sshll.u32 %s627_s18, 4  ;;  %s543_s24 = int_to_ptr.vmem [resolvable:$false] %s542_s24 }
  0x3f   : > { %s544_s25 = scalar_lea.vmem %s543_s24, 256  ;;  %p545_p3 = scmp.lt.s32.totalorder %s751_s22, %s543_s24 }
  0x40   : > { %p540_p10 = pnand %p538_p8, %p524_p0  ;;  %p546_p7 = scmp.lt.s32.totalorder %s544_s25, %s537_s7 }
  0x42   : > { %p541_p13 = pneg %p540_p10  ;;  %p547_p9 = por %p546_p7, %p545_p3 }
  0x44   : > { %p548_p2 = pnand %p547_p9, %p541_p13 }
  0x46   : > { %551 = shalt.err (!%p548_p2)
}
  0x47   : > { %443 = dma.hbm_to_vmem [thread:$0]  (!%p747_p11), %s745_s27, 128, %s751_s22, %s124_s28  }
  0x48   : > { %p863_p5 = scmp.ne.s32.totalorder %s858_s17, 0 }
  0x49   : > { %s781_s20 = sand.u32 (!%p863_p5), 1, %s614_s10   ;;  %p864_p0 = scmp.ne.s32.totalorder (!%p863_p5), %s856_s15, 0 }
  0x4a   : > { %143 = sbr.rel (%p863_p5) target bundleno = 303 (0x12f), region = 28  ;;  %s421_s26 = sshll.u32 (!%p863_p5), %s781_s20, 3 }
  0x4b   : > { %s146_s19 = scalar_lea.sflag (!%p863_p5), [#allocation3], %s781_s20  ;;  %s149_s29 = scalar_lea.vmem (!%p863_p5), [#allocation2], %s421_s26 }
  0x51   : > { %597 = dma.done.wait (%p864_p0), %s146_s19, 128  }
  0x52   : > { %599 = vsyncadd (%p864_p0), %s146_s19, 4294967168  ;;  %p865_p11 = scmp.eq.s32.totalorder %s666_s13, 0 }
  0x54   : > { %601 = dma.done.wait (%p865_p11), [#allocation6], 384   ;;  %p866_p1 = pmov %p865_p11 }
  0x55   : > { %v179_v0 = vlaneseq  ;;  %v628_v1 = vmov 27   ;;  %v174_v6 = vld [vmem:[%s149_s29] sm:$0xff]  ;;  %v176_v7 = vld [vmem:[#allocation5 + $0x8] sm:$0xff]  ;;  %v175_v22 = vld [vmem:[#allocation5] sm:$0xff]  ;;  %s425_s15 = sshll.u32 %s666_s13, 7  ;;  %s173_s17 = scalar_lea.vmem [#allocation7], %s421_s26 }
  0x56   : > { %603 = vsyncadd (%p866_p1), [#allocation6], 4294966912  ;;  %489 = vset.pattern.permute.xlu1 %v628_v1  ;;  %488 = vset.pattern.permute.xlu0 %v628_v1  ;;  %v177_v8 = vld [vmem:[#allocation5 + $0x10] sm:$0xff]  ;;  %v178_v9 = vmul.f32 %v174_v6, %v174_v6  ;;  %s334_s27 = sshll.u32 %s173_s17, 4  ;;  %s806_s28 = scalar_lea.hbm %s852_s2, %s425_s15  ;;  %s808_s27 = int_to_ptr.vmem [resolvable:$true] %s334_s27 }
  0x57   : > { %v180_v2 = vshrl.u32 %v179_v0, 7  ;;  %s321_s30 = scalar_lea.sflag [#allocation4], %s781_s20  ;;  %s552_s3 = scalar_lea.vmem %s808_s27, 128 }
  0x58   : > { %p553_p4 = scmp.ne.s32.totalorder %s808_s27, %s552_s3  ;;  %s629_s13 = smov [#allocation7]  }
  0x59   : > { %v181_v3 = vsub.s32 7, %v180_v2  ;;  %v186_v4 = vsub.s32 0, %v180_v2  ;;  %v795_v5 = vsub.s32 1, %v180_v2  ;;  %v228_v12 = vsub.s32 2, %v180_v2  ;;  %s556_s4 = sshll.u32 %s629_s13, 4  ;;  %s557_s4 = int_to_ptr.vmem [resolvable:$false] %s556_s4 }
  0x5a   : > { %v261_v20 = vsub.s32 6, %v180_v2  ;;  %v239_v32 = vsub.s32 3, %v180_v2  ;;  %v250_v33 = vsub.s32 4, %v180_v2  ;;  %v256_v36 = vsub.s32 5, %v180_v2  ;;  %p554_p6 = pnand %p553_p4, %p736_p12  ;;  %s558_s5 = scalar_lea.vmem %s557_s4, 256 }
  0x5b   : > { %v182_v10 = vrot.slane %v176_v7, %v181_v3  ;;  %v187_v11 = vrot.slane %v177_v8, %v186_v4  ;;  %v274_v13 = vrot.slane %v176_v7, %v186_v4  ;;  %v193_v16 = vrot.slane %v177_v8, %v795_v5  ;;  %p559_p10 = scmp.lt.s32.totalorder %s808_s27, %s557_s4  ;;  %p560_p13 = scmp.lt.s32.totalorder %s558_s5, %s552_s3 }
  0x5c   : > { %v286_v17 = vrot.slane %v176_v7, %v228_v12  ;;  %v262_v25 = vrot.slane %v175_v22, %v261_v20  ;;  %v268_v26 = vrot.slane %v175_v22, %v181_v3  ;;  %v293_v34 = vrot.slane %v176_v7, %v239_v32  ;;  %p555_p8 = pneg %p554_p6 }
  0x5d   : > { %v183_v14 = vmul.f32 %v182_v10, %v178_v9  ;;  %v188_v15 = vmul.f32 %v187_v11, %v174_v6  ;;  %v300_v35 = vrot.slane %v176_v7, %v250_v33  ;;  %v307_v37 = vrot.slane %v176_v7, %v256_v36  ;;  %p561_p3 = por %p560_p13, %p559_p10 }
  0x5e   : > { %v314_v38 = vrot.slane %v176_v7, %v261_v20  ;;  %v280_v39 = vrot.slane %v176_v7, %v795_v5  ;;  %v206_v42 = vrot.slane %v175_v22, %v186_v4  ;;  %v217_v43 = vrot.slane %v175_v22, %v795_v5 }
  0x5f   : > { %v189_v18 = vadd.f32 %v188_v15, %v183_v14  ;;  %v229_v44 = vrot.slane %v175_v22, %v228_v12  ;;  %v240_v47 = vrot.slane %v175_v22, %v239_v32  ;;  %v251_v52 = vrot.slane %v175_v22, %v250_v33  ;;  %p562_p7 = pnand %p561_p3, %p555_p8 }
  0x60   : > { %v257_v57 = vrot.slane %v175_v22, %v256_v36 }
  0x61   : > { %v194_v19 = vadd.f32 %v193_v16, %v189_v18 }
  0x63   : > { %490 = vrsqrt.f32 %v194_v19 }
  0x6d   : > { %v491_v21 = vpop.eup %490 }
  0x6e   : > { %v220_v23 = vmul.f32 %v491_v21, %v491_v21  ;;  %v196_v24 = vmul.f32 %v491_v21, %v174_v6  ;;  %v287_v0 = vmul.f32 %v491_v21, %v286_v17 }
  0x70   : > { %223 = vperm.xlu1 %489, %v220_v23   ;;  %v275_v27 = vmul.f32 %v274_v13, %v220_v23  ;;  %v197_v28 = vmul.f32 %v196_v24, %v196_v24  ;;  %v208_v29 = vmul.f32 %v491_v21, %v196_v24  ;;  %v281_v62 = vmul.f32 %v280_v39, %v196_v24 }
  0x72   : > { %200 = vperm.xlu0 %488, %v197_v28   ;;  %v263_v30 = vmul.f32 %v262_v25, %v197_v28  ;;  %v269_v31 = vmul.f32 %v268_v26, %v208_v29 }
  0x74   : > { %234 = vperm.xlu1 %489, %v196_v24  }
  0x76   : > { %211 = vperm.xlu0 %488, %v208_v29  }
  0x7a   : > { %245 = vperm.xlu0 %488, %v491_v21  }
  0xef   : > { %v224_v40 = vpop.permute.xlu1 %223 }
  0xf0   : > { %v230_v50 = vmul.f32 %v229_v44, %v224_v40 }
  0xf1   : > { %v201_v41 = vpop.permute.xlu0 %200 }
  0xf2   : > { %v207_v46 = vmul.f32 %v206_v42, %v201_v41 }
  0xf3   : > { %v235_v49 = vpop.permute.xlu1 %234 }
  0xf4   : > { %v241_v54 = vmul.f32 %v240_v47, %v235_v49  ;;  %v289_v1 = vmul.f32 %v235_v49, %v196_v24  ;;  %v296_v3 = vmul.f32 %v491_v21, %v235_v49 }
  0xf5   : > { %v212_v45 = vpop.permute.xlu0 %211 }
  0xf6   : > { %v218_v48 = vmul.f32 %v217_v43, %v212_v45  ;;  %v294_v5 = vmul.f32 %v293_v34, %v289_v1  ;;  %v301_v8 = vmul.f32 %v300_v35, %v296_v3 }
  0xf8   : > { %v219_v51 = vadd.f32 %v218_v48, %v207_v46 }
  0xf9   : > { %v246_v53 = vpop.permute.xlu0 %245 }
  0xfa   : > { %v231_v55 = vadd.f32 %v230_v50, %v219_v51  ;;  %v252_v58 = vmul.f32 %v251_v52, %v246_v53  ;;  %v303_v7 = vmul.f32 %v246_v53, %v196_v24  ;;  %v310_v10 = vmul.f32 %v491_v21, %v246_v53 }
  0xfc   : > { %v242_v56 = vadd.f32 %v241_v54, %v231_v55  ;;  %v308_v12 = vmul.f32 %v307_v37, %v303_v7  ;;  %v315_v14 = vmul.f32 %v314_v38, %v310_v10 }
  0xfe   : > { %v253_v59 = vadd.f32 %v252_v58, %v242_v56 }
 0x100   : > { %v258_v60 = vadd.f32 %v257_v57, %v253_v59 }
 0x102   : > { %v264_v61 = vadd.f32 %v263_v30, %v258_v60 }
 0x104   : > { %v270_v63 = vadd.f32 %v269_v31, %v264_v61 }
 0x106   : > { %v276_v2 = vadd.f32 %v275_v27, %v270_v63 }
 0x108   : > { %v282_v4 = vadd.f32 %v281_v62, %v276_v2 }
 0x10a   : > { %v288_v6 = vadd.f32 %v287_v0, %v282_v4 }
 0x10c   : > { %v295_v9 = vadd.f32 %v294_v5, %v288_v6 }
 0x10e   : > { %v302_v11 = vadd.f32 %v301_v8, %v295_v9 }
 0x110   : > { %v309_v13 = vadd.f32 %v308_v12, %v302_v11 }
 0x112   : > { %v316_v15 = vadd.f32 %v315_v14, %v309_v13 }
 0x114   : > { %v317_v16 = vmul.f32 1.442695, %v316_v15 }
 0x116   : > { %492 = vpow2.f32 %v317_v16 }
 0x120   : > { %v493_v17 = vpop.eup %492 }
 0x121   : > { %319 = vst [vmem:[%s173_s17] sm:$0xff] %v493_v17 }
 0x122   : > { %565 = shalt.err (!%p562_p7)
}
 0x123   : > { %s566_s6 = scalar_lea.hbm %s806_s28, 128  ;;  %s570_s24 = scalar_lea.hbm %s852_s2, 256 }
 0x124   : > { %p567_p9 = scmp.ne.s32.totalorder %s806_s28, %s566_s6  ;;  %p571_p0 = scmp.lt.u32.totalorder %s806_s28, %s852_s2 }
 0x125   : > { %p572_p11 = scmp.lt.u32.totalorder %s570_s24, %s566_s6  ;;  %p574_p4 = scmp.lt.u32.totalorder %s566_s6, %s806_s28 }
 0x126   : > { %p568_p2 = pnand %p567_p9, %p736_p12 }
 0x127   : > { %p573_p1 = por %p572_p11, %p571_p0 }
 0x128   : > { %p569_p5 = pneg %p568_p2 }
 0x129   : > { %p575_p6 = por %p574_p4, %p573_p1 }
 0x12b   : > { %p576_p8 = pnand %p575_p6, %p569_p5 }
 0x12d   : > { %579 = shalt.err (!%p576_p8)
}
 0x12e   : > { %434 = dma.vmem_to_hbm [thread:$0]  (%p736_p12), %s808_s27, 128, %s806_s28, %s321_s30  }
 0x12f PF: > { %s346_s26 = sand.u32 1, %s610_s9   ;;  %p867_p10 = scmp.ne.s32.totalorder %s857_s16, 0 }
 0x130   : > { %p868_p13 = scmp.ge.s32.totalorder %s622_s12, 2  ;;  %s347_s19 = scalar_lea.sflag [#allocation4], %s346_s26 }
 0x132   : > { %p445_p3 = pnand %p868_p13, %p867_p10 }
 0x134   : > { %605 = dma.done.wait (!%p445_p3), %s347_s19, 128  }
 0x135   : > { %607 = vsyncadd (!%p445_p3), %s347_s19, 4294967168  ;;  %p16_p7 = scmp.ge.s32.totalorder %s701_s21, 4   ;;  %s869_s9 = smov %s614_s10 }
 0x136   : > { %s870_s10 = smov %s618_s11  ;;  %s871_s11 = smov %s732_s8 }
 0x137   : > { %s872_s12 = smov %s701_s21  ;;  %18 = sbr.rel (!%p16_p7) target bundleno = 6 (0x6), region = 77 }
 0x13e   :  { %352 = vsyncpa [#allocation3], 1 }
 0x13f   :  { %354 = vsyncpa [#allocation3 + $0x1], 1 }
 0x140   :  { %355 = vsyncpa [#allocation6], 1 }
 0x141   :  { %356 = vsyncpa [#allocation4], 1 }
 0x142   :  { %358 = vsyncpa [#allocation4 + $0x1], 1 }

</bundles_post_ra>
